<compile_context>
chip_gen: v7x
topology: tpu7x:2x2x1
jax: 0.10.0
libtpu: 0.0.40
codegen_flags: <defaults>
</compile_context>

<pallas_src>
import functools
import math

import jax
import jax.numpy as jnp
from jax import lax
from jax.experimental import pallas as pl
from jax.experimental.pallas import tpu as pltpu


def _round_up(x: int, m: int) -> int:
    return (x + m - 1) // m * m


def _vmem_capacity_bytes() -> int:
    """Physical VMEM per TensorCore; conservative fallback if unqueryable."""
    try:
        return int(pltpu.get_tpu_info().vmem_capacity_bytes)
    except Exception:
        return 64 << 20  # v7x is the smallest current part (64 MiB / TC)


# ---------------------------------------------------------------------------
# Path A: small table -> pin the whole table in VMEM, gather in-kernel.
# ---------------------------------------------------------------------------
def _resident_kernel(ids_ref, table_ref, out_ref, *, scale, v_chunk, precision):
    # ids_ref:   (T, 1) int32 VMEM block of token ids
    # table_ref: (V_pad, D) VMEM block; constant block index -> DMA'd once.
    # out_ref:   (T, D) VMEM output block (sublane/lane-dense store)
    tok_block = ids_ref.shape[0]
    v_pad, d = table_ref.shape
    n_chunks = v_pad // v_chunk

    ids = ids_ref[...]                                               # (T, 1)
    # Column iota built once per grid step, reused for every vocab chunk.
    col = lax.broadcasted_iota(jnp.int32, (tok_block, v_chunk), 1)   # (T, Vc)

    def body(c, acc):
        start = pl.multiple_of(c * v_chunk, v_chunk)
        chunk = table_ref[pl.ds(start, v_chunk), :]                  # (Vc, D)
        onehot = (ids - c * v_chunk == col).astype(table_ref.dtype)  # (T, Vc)
        return acc + jnp.dot(onehot, chunk,
                             preferred_element_type=jnp.float32,
                             precision=precision)

    acc = lax.fori_loop(0, n_chunks, body,
                        jnp.zeros((tok_block, d), jnp.float32))
    out_ref[...] = (acc * scale).astype(out_ref.dtype)


def _embedding_resident(flat_ids, table, *, tok_block, scale):
    n = flat_ids.shape[0]
    V, D = table.shape
    itemsize = jnp.dtype(table.dtype).itemsize

    tok_block = min(tok_block, _round_up(n, 8))       # multiple of 8 (dense st)
    n_pad = _round_up(n, tok_block)
    ids = jnp.pad(flat_ids, (0, n_pad - n)).reshape(n_pad, 1)

    # Vocab chunk for the in-kernel one-hot gather; padded rows are all-zero
    # and never selected (ids are clamped to [0, V-1] in the wrapper).
    v_chunk = min(1024, _round_up(V, 128))
    v_pad = _round_up(V, v_chunk)
    table_p = table if v_pad == V else jnp.pad(table, ((0, v_pad - V), (0, 0)))

    # 0/1 one-hot x bf16 with f32 accumulation is exact; only f32 tables need
    # the multi-pass HIGHEST matmul.
    precision = (lax.Precision.HIGHEST if table.dtype == jnp.float32
                 else lax.Precision.DEFAULT)

    table_bytes = v_pad * D * itemsize
    block_bytes = tok_block * D * itemsize
    # The constant-index table block is still double-buffered by the pipeline;
    # budget 2x table + pipelined ids/out blocks + headroom, capped by chip.
    needed = 2 * table_bytes + 4 * block_bytes + (8 << 20)
    vmem_limit = min(int(0.85 * _vmem_capacity_bytes()), max(needed, 32 << 20))

    out = pl.pallas_call(
        functools.partial(_resident_kernel, scale=scale, v_chunk=v_chunk,
                          precision=precision),
        out_shape=jax.ShapeDtypeStruct((n_pad, D), table.dtype),
        grid=(n_pad // tok_block,),
        in_specs=[
            pl.BlockSpec((tok_block, 1), lambda i: (i, 0)),
            pl.BlockSpec((v_pad, D), lambda i: (0, 0)),  # whole table, resident
        ],
        out_specs=pl.BlockSpec((tok_block, D), lambda i: (i, 0)),
        compiler_params=pltpu.CompilerParams(
            # No carried state across steps -> safe to megacore-split on v7x.
            dimension_semantics=("parallel",),
            vmem_limit_bytes=vmem_limit,
        ),
    )(ids, table_p)
    return out[:n]


# ---------------------------------------------------------------------------
# Path B: large table -> table stays in HBM, double-buffered row-DMA gather.
# ---------------------------------------------------------------------------
def _dma_gather_kernel(ids_ref, table_hbm, out_ref, gbuf, sems, *, scale,
                       tok_block):
    # ids_ref:   (M_pad,) int32 token ids, scalar-prefetched into SMEM
    # table_hbm: (V, D) ref left in HBM (memory_space=pl.ANY)
    # out_ref:   (TOK_BLOCK, D) VMEM output block
    # gbuf:      (2, TOK_BLOCK, D) VMEM double-buffered gather landing buffer
    # sems:      (2,) DMA semaphores, one per slot
    i = pl.program_id(0)
    n_blk = pl.num_programs(0)
    slot = lax.rem(i, 2)

    def issue(block_idx, dst_slot):
        base = block_idx * tok_block
        # Start every row DMA of the block before any wait so they all overlap.
        @pl.loop(0, tok_block)
        def _start(t):
            token = ids_ref[base + t]
            pltpu.make_async_copy(
                table_hbm.at[pl.ds(token, 1), :],
                gbuf.at[dst_slot, pl.ds(t, 1), :],
                sems.at[dst_slot],
            ).start()

    # Prime slot 0 with the first block.
    @pl.when(i == 0)
    def _prime():
        issue(0, 0)

    # Prefetch the next block into the other slot before waiting on this one,
    # hiding its HBM latency behind this block's scale + store.
    @pl.when(i + 1 < n_blk)
    def _prefetch_next():
        issue(i + 1, 1 - slot)

    # One aggregate wait: all tok_block single-row copies of this slot share
    # sems[slot]; a single descriptor covering the whole (tok_block, D) slab
    # retires the same byte count with one semaphore op (a wait never copies —
    # only the descriptor's byte count and semaphore matter).
    pltpu.make_async_copy(gbuf.at[slot], gbuf.at[slot], sems.at[slot]).wait()

    out_ref[...] = (gbuf[slot].astype(jnp.float32) * scale).astype(out_ref.dtype)


def _embedding_dma_gather(flat_ids, table, *, tok_block, scale):
    n = flat_ids.shape[0]
    V, D = table.shape
    itemsize = jnp.dtype(table.dtype).itemsize

    # Keep the double-buffered gather slab + pipelined output blocks small
    # enough for v7x's 64 MiB VMEM even for very wide embeddings.
    # TODO(synk): tile D with a second grid axis instead of shrinking tok_block
    # when emb_dim is very large (>= 4096).
    tok_block = min(tok_block, _round_up(n, 8))
    tok_block = max(8, min(tok_block, ((4 << 20) // (D * itemsize)) // 8 * 8))

    block_bytes = tok_block * D * itemsize
    vmem_limit = min(int(0.85 * _vmem_capacity_bytes()),
                     max(4 * block_bytes + (8 << 20), 32 << 20))

    kernel = functools.partial(_dma_gather_kernel, scale=scale,
                               tok_block=tok_block)

    def gather_one(ids_1d):
        m = ids_1d.shape[0]
        m_pad = _round_up(m, tok_block)
        ids_p = jnp.pad(ids_1d, (0, m_pad - m))
        out = pl.pallas_call(
            kernel,
            out_shape=jax.ShapeDtypeStruct((m_pad, D), table.dtype),
            grid_spec=pltpu.PrefetchScalarGridSpec(
                num_scalar_prefetch=1,                         # ids land in SMEM
                grid=(m_pad // tok_block,),
                in_specs=[pl.BlockSpec(memory_space=pl.ANY)],  # table stays HBM
                out_specs=pl.BlockSpec((tok_block, D), lambda i, ids: (i, 0)),
                scratch_shapes=[
                    pltpu.VMEM((2, tok_block, D), table.dtype),
                    pltpu.SemaphoreType.DMA((2,)),
                ],
            ),
            compiler_params=pltpu.CompilerParams(
                # Cross-step double buffering carries scratch state, so this
                # grid axis must run sequentially (no megacore split).
                dimension_semantics=("arbitrary",),
                vmem_limit_bytes=vmem_limit,
            ),
        )(ids_p, table)
        return out[:m]

    # Bound the scalar-prefetched id array (a 1-D SMEM array pads to the next
    # power of two of 4*N bytes) by chunking the token stream per pallas_call.
    max_tokens_per_call = 32 * 1024
    if n <= max_tokens_per_call:
        return gather_one(flat_ids)
    chunk = max(tok_block, (max_tokens_per_call // tok_block) * tok_block)
    pieces = [gather_one(flat_ids[s:s + chunk]) for s in range(0, n, chunk)]
    return jnp.concatenate(pieces, axis=0)


# ---------------------------------------------------------------------------
# Public entry point: table[token_ids] * sqrt(emb_dim)
# ---------------------------------------------------------------------------
def embedding_forward(token_ids: jax.Array, table: jax.Array, *,
                      tok_block: int | None = None,
                      resident_max_vocab: int = 4096,
                      resident_max_table_bytes: int | None = None) -> jax.Array:
    """nn.Embedding forward with the sqrt(emb_dim) scale.

    Small tables (vocab <= resident_max_vocab AND bytes within the chip-derived
    VMEM budget) are pinned whole in VMEM and gathered with a vocab-chunked
    one-hot MXU matmul; larger tables stay in HBM and rows are gathered with
    overlapped, cross-step double-buffered row DMAs.
    """
    B, S = token_ids.shape
    V, D = table.shape
    scale = math.sqrt(D)

    flat_ids = token_ids.reshape(B * S).astype(jnp.int32)
    # PyTorch raises on out-of-range ids; clamp so an invalid id can never
    # become an out-of-bounds DMA.  Valid inputs are unaffected.
    flat_ids = jnp.clip(flat_ids, 0, V - 1)

    if resident_max_table_bytes is None:
        # Leave room for the pipeline's 2x buffering of the table plus the
        # one-hot/accumulator intermediates within this chip's VMEM.
        resident_max_table_bytes = _vmem_capacity_bytes() // 8

    table_bytes = V * D * jnp.dtype(table.dtype).itemsize
    # The one-hot gather costs O(T*V) VALU + O(T*V*D) MXU per block, so cap by
    # vocab size (conservative for v5e) as well as by VMEM footprint.
    if V <= resident_max_vocab and table_bytes <= resident_max_table_bytes:
        out = _embedding_resident(
            flat_ids, table, tok_block=tok_block or 256, scale=scale)
    else:
        out = _embedding_dma_gather(
            flat_ids, table, tok_block=tok_block or 512, scale=scale)
    return out.reshape(B, S, D)


if __name__ == "__main__":
    # Small deterministic setup consistent with the module's forward:
    #   x: [batch, seq_len] integer token ids
    #   embeddings.weight: [vocab_size, emb_dim]
    batch, seq_len = 2, 8
    vocab_size, emb_dim = 64, 128

    key = jax.random.PRNGKey(0)
    k_ids, k_w = jax.random.split(key)

    token_ids = jax.random.randint(k_ids, (batch, seq_len), 0, vocab_size,
                                   dtype=jnp.int32)
    emb_table = jax.random.normal(k_w, (vocab_size, emb_dim), dtype=jnp.float32)

    ref = emb_table[token_ids] * math.sqrt(emb_dim)

    # Path A (default dispatch here: 64x128 f32 = 32 KiB table -> resident).
    out_resident = jax.block_until_ready(embedding_forward(token_ids, emb_table))
    assert out_resident.shape == (batch, seq_len, emb_dim)
    # One-hot gather runs on the MXU; allow for reduced-precision f32 passes.
    assert jnp.allclose(out_resident, ref, rtol=5e-3, atol=5e-3)

    # Path B (force the large-table HBM DMA-gather path on the same data).
    out_gather = jax.block_until_ready(
        embedding_forward(token_ids, emb_table, resident_max_vocab=0))
    assert out_gather.shape == (batch, seq_len, emb_dim)
    assert jnp.allclose(out_gather, ref, rtol=1e-6, atol=1e-6)

    print("KERNEL_OK")
</pallas_src>

<mosaic_0001>
module attributes {stable_mosaic.version = 11 : i64} {
  func.func @_resident_kernel(%arg0: i32, %arg1: memref<16x1xi32, #tpu.memory_space<vmem>>, %arg2: memref<128x128xf32, #tpu.memory_space<vmem>>, %arg3: memref<16x128xf32, #tpu.memory_space<vmem>>) attributes {dimension_semantics = [#tpu.dimension_semantics<parallel>], iteration_bounds = array<i64: 1>, scalar_prefetch = 0 : i64, scratch_operands = 0 : i64, tpu.core_type = #tpu.core_type<tc>, window_params = [{transform_indices = @transform_0, window_bounds = array<i64: 16, 1>}, {pipeline_mode = #tpu.pipeline_mode<synchronous>, transform_indices = @transform_1, window_bounds = array<i64: 128, 128>}, {transform_indices = @transform_2, window_bounds = array<i64: 16, 128>}]} {
    %c0 = arith.constant 0 : index
    %c0_0 = arith.constant 0 : index
    %0 = vector.load %arg1[%c0, %c0_0] : memref<16x1xi32, #tpu.memory_space<vmem>>, vector<16x1xi32>
    %1 = tpu.iota {dimensions = array<i32: 1>} : vector<16x128xi32>
    %cst = arith.constant 0.000000e+00 : f32
    %2 = vector.broadcast %cst : f32 to vector<16x128xf32>
    %c0_i32 = arith.constant 0 : i32
    %c128_i32 = arith.constant 128 : i32
    %3 = arith.muli %c0_i32, %c128_i32 : i32
    %4 = tpu.assume_multiple %3, 128 : i32
    %5 = arith.index_cast %4 : i32 to index
    %c0_1 = arith.constant 0 : index
    %6 = vector.load %arg2[%5, %c0_1] : memref<128x128xf32, #tpu.memory_space<vmem>>, vector<128x128xf32>
    %c128_i32_2 = arith.constant 128 : i32
    %7 = arith.muli %c0_i32, %c128_i32_2 : i32
    %8 = vector.broadcast %7 : i32 to vector<16x1xi32>
    %9 = arith.subi %0, %8 : vector<16x1xi32>
    %10 = vector.broadcast %9 : vector<16x1xi32> to vector<16x128xi32>
    %11 = arith.cmpi eq, %10, %1 : vector<16x128xi32>
    %12 = arith.extui %11 : vector<16x128xi1> to vector<16x128xi32>
    %13 = arith.sitofp %12 : vector<16x128xi32> to vector<16x128xf32>
    %cst_3 = arith.constant dense<0.000000e+00> : vector<16x128xf32>
    %14 = tpu.matmul %13, %6, %cst_3 {dimension_numbers = #tpu.dot_dimension_numbers<[1], [0], [0], [1], [0, 0, 1, 1], [], []>, precision = #tpu.contract_precision<fp32>} : vector<16x128xf32>, vector<128x128xf32>, vector<16x128xf32> -> vector<16x128xf32>
    %15 = arith.addf %2, %14 : vector<16x128xf32>
    %c1_i32 = arith.constant 1 : i32
    %cst_4 = arith.constant 11.3137083 : f32
    %16 = vector.broadcast %cst_4 : f32 to vector<16x128xf32>
    %17 = arith.mulf %15, %16 : vector<16x128xf32>
    %c0_5 = arith.constant 0 : index
    %c0_6 = arith.constant 0 : index
    %18 = vector.load %arg3[%c0_5, %c0_6] : memref<16x128xf32, #tpu.memory_space<vmem>>, vector<16x128xf32>
    tpu.vector_store %arg3[%c0_5, %c0_6], %17 {strides = array<i32>} : memref<16x128xf32, #tpu.memory_space<vmem>>, vector<16x128xf32>,
    return
  }
  func.func @transform_0(%arg0: i32) -> (i32, i32) {
    %c0_i32 = arith.constant 0 : i32
    %c0_i32_0 = arith.constant 0 : i32
    return %arg0, %c0_i32 : i32, i32
  }
  func.func @transform_1(%arg0: i32) -> (i32, i32) {
    %c0_i32 = arith.constant 0 : i32
    %c0_i32_0 = arith.constant 0 : i32
    %c0_i32_1 = arith.constant 0 : i32
    return %c0_i32, %c0_i32_0 : i32, i32
  }
  func.func @transform_2(%arg0: i32) -> (i32, i32) {
    %c0_i32 = arith.constant 0 : i32
    %c0_i32_0 = arith.constant 0 : i32
    return %arg0, %c0_i32 : i32, i32
  }
}

</mosaic_0001>

<bundles_post_ra>
// kernel: tpu_custom_call.1
= control target key start
LH: loop header
LB: loop body
LE: loop exit
PB: predicated region body
PF: predicated region fallthrough
CT: control target
= control target key end

     0   :  { %7 = vsyncpa [#allocation3], 0  ;;  %s1661_s0 = inlined_call_operand.vmem [shape: s32[16,1], index: 0, kind: input, shape index: {}]   ;;  %s1662_s1 = inlined_call_operand.hbm [shape: f32[128,128], index: 1, kind: input, shape index: {}]   ;;  %s1663_s2 = inlined_call_operand.hbm [shape: f32[16,128], index: 2, kind: output, shape index: {}]  }
   0x1   :  { %8 = vsyncpa [#allocation4], 0  ;;  %s1347_s9 = smov [#allocation2]   ;;  %s1299_s13 = scalar_lea.hbm %s1662_s1, 2048 }
   0x2   :  { %s16_s10 = sshll.u32 %s1347_s9, 4  ;;  %p1300_p0 = scmp.ne.s32.totalorder %s1662_s1, %s1299_s13  ;;  %s17_s10 = int_to_ptr.vmem [resolvable:$true] %s16_s10 }
   0x3   :  { %p1303_p1 = scmp.lt.u32.totalorder %s1299_s13, %s1662_s1 }
   0x5   :  { %p1305_p2 = pnand %p1303_p1, %p1300_p0 }
   0x7   :  { %1308 = shalt.err (!%p1305_p2)
}
   0x8   :  { %s1309_s18 = scalar_lea.vmem %s17_s10, 2048  ;;  %p1314_p4 = scmp.lt.s32.totalorder %s17_s10, %s17_s10 }
   0x9   :  { %p1310_p3 = scmp.ne.s32.totalorder %s17_s10, %s1309_s18  ;;  %p1315_p5 = scmp.lt.s32.totalorder %s1309_s18, %s1309_s18 }
   0xb   :  { %p1316_p6 = por %p1315_p5, %p1314_p4 }
   0xd   :  { %p1317_p7 = pnand %p1316_p6, %p1310_p3 }
   0xf   :  { %1320 = shalt.err (!%p1317_p7)
}
  0x10   :  { %s1348_s19 = smov 128   ;;  %s1349_s20 = smov 8  }
  0x11   :  { %22 = dma.hbm_to_vmem [thread:$0]  %s1662_s1, 2048, %s17_s10, [#allocation3], %s1348_s19, %s1348_s19, %s1349_s20  }
  0x12   :  { %1343 = dma.done.wait [#allocation3], 2048  }
  0x13   :  { %1344 = vsyncadd [#allocation3], 4294965248  ;;  %v1350_v0 = vmov 0   ;;  %v26_v1 = vld [vmem:[%s1661_s0] sm:$0xff]  ;;  %v31_v3 = vld [vmem:[#allocation2 + $0x8] sm:$0xff] }
  0x14   :  { %1298 = vset.pattern.permute.xlu0 %v1350_v0  ;;  %v30_v2 = vld [vmem:[#allocation2] sm:$0xff]  ;;  %v32_v5 = vld [vmem:[#allocation2 + $0x10] sm:$0xff]  ;;  %v33_v6 = vld [vmem:[#allocation2 + $0x18] sm:$0xff]  ;;  %v62_v8 = vand.u32 4294901760, %v31_v3 }
  0x15   :  { %47 = vperm.xlu0 %1298, %v26_v1   ;;  %v59_v4 = vand.u32 4294901760, %v30_v2  ;;  %v27_v7 = vld [vmem:[%s1661_s0 + $0x8] sm:$0xff]  ;;  %v65_v9 = vand.u32 4294901760, %v32_v5  ;;  %v68_v10 = vand.u32 4294901760, %v33_v6  ;;  %v34_v11 = vld [vmem:[#allocation2 + $0x20] sm:$0xff]  ;;  %v36_v17 = vld [vmem:[#allocation2 + $0x30] sm:$0xff] }
  0x16   :  { %v35_v12 = vld [vmem:[#allocation2 + $0x28] sm:$0xff]  ;;  %v71_v15 = vand.u32 4294901760, %v34_v11  ;;  %v37_v18 = vld [vmem:[#allocation2 + $0x38] sm:$0xff]  ;;  %v77_v20 = vand.u32 4294901760, %v36_v17  ;;  %v38_v22 = vld [vmem:[#allocation2 + $0x40] sm:$0xff]  ;;  %v1440_v46 = vsub.f32 %v31_v3, %v62_v8  ;;  %s1353_s0 = smov [#allocation5]  }
  0x17   :  { %v1390_v13 = vpack.c.bf16 %v62_v8, %v59_v4  ;;  %v1392_v14 = vpack.c.bf16 %v68_v10, %v65_v9  ;;  %v74_v16 = vand.u32 4294901760, %v35_v12  ;;  %v80_v21 = vand.u32 4294901760, %v37_v18  ;;  %v39_v23 = vld [vmem:[#allocation2 + $0x48] sm:$0xff]  ;;  %v1408_v28 = vld [vmem:[#allocation2 + $0x50] sm:$0xff]  ;;  %v1416_v32 = vld [vmem:[#allocation2 + $0x58] sm:$0xff]  ;;  %s751_s1 = sshll.u32 %s1353_s0, 4  ;;  %s752_s1 = int_to_ptr.vmem [resolvable:$true] %s751_s1 }
  0x18   :  { %v1402_v24 = vsub.f32 %v32_v5, %v65_v9  ;;  %v1404_v25 = vsub.f32 %v33_v6, %v68_v10  ;;  %v83_v26 = vand.u32 4294901760, %v38_v22  ;;  %v86_v27 = vand.u32 4294901760, %v39_v23  ;;  %v1432_v41 = vld [vmem:[#allocation2 + $0x60] sm:$0xff]  ;;  %v1436_v44 = vld [vmem:[#allocation2 + $0x68] sm:$0xff]  ;;  %v1460_v58 = vld [vmem:[#allocation2 + $0x70] sm:$0xff]  ;;  %s1321_s27 = scalar_lea.vmem %s752_s1, 256  ;;  %p1326_p9 = scmp.lt.s32.totalorder %s752_s1, %s752_s1 }
  0x19   :  { %50 = vperm.xlu0 %1298, %v27_v7   ;;  %1186 = vmatprep.subr.bf16.mxu0 %v1390_v13  ;;  %v1400_v19 = vpack.c.bf16 %v74_v16, %v71_v15  ;;  %v1414_v31 = vpack.c.bf16 %v80_v21, %v77_v20  ;;  %v89_v36 = vand.u32 4294901760, %v1408_v28  ;;  %v1423_v37 = vsub.f32 %v34_v11, %v71_v15  ;;  %v45_v61 = vld [vmem:[#allocation2 + $0x78] sm:$0xff]  ;;  %p1322_p8 = scmp.ne.s32.totalorder %s752_s1, %s1321_s27  ;;  %p1327_p10 = scmp.lt.s32.totalorder %s1321_s27, %s1321_s27 }
  0x1a   :  { %1090 = vmatprep.subr.bf16.mxu1 %v1390_v13  ;;  %1188 = vmatpush3.bf16.msra.mxu0 %v1390_v13  ;;  %v176_v29 = vand.u32 4294901760, %v1402_v24  ;;  %v183_v30 = vand.u32 4294901760, %v1404_v25  ;;  %v1425_v38 = vsub.f32 %v35_v12, %v74_v16  ;;  %v1429_v39 = vpack.c.bf16 %v86_v27, %v83_v26 }
  0x1b   :  { %1092 = vmatpush3.bf16.msra.mxu1 %v1390_v13  ;;  %1190 = vmatprep.subr.bf16.mxu0 %v1392_v14  ;;  %v92_v40 = vand.u32 4294901760, %v1416_v32  ;;  %v1438_v45 = vsub.f32 %v30_v2, %v59_v4  ;;  %v190_v47 = vand.u32 4294901760, %v1423_v37  ;;  %v1446_v50 = vsub.f32 %v36_v17, %v77_v20  ;;  %p1328_p11 = por %p1327_p10, %p1326_p9 }
  0x1c   :  { %1094 = vmatprep.subr.bf16.mxu1 %v1392_v14  ;;  %v1418_v33 = vpack.c.bf16 %v183_v30, %v176_v29  ;;  %v177_v34 = vsub.f32 %v1402_v24, %v176_v29  ;;  %v184_v35 = vsub.f32 %v1404_v25, %v183_v30  ;;  %v197_v48 = vand.u32 4294901760, %v1425_v38 }
  0x1d   :  { %v1448_v51 = vsub.f32 %v37_v18, %v80_v21  ;;  %v95_v52 = vand.u32 4294901760, %v1432_v41  ;;  %v191_v54 = vsub.f32 %v1423_v37, %v190_v47  ;;  %v1457_v56 = vpack.c.bf16 %v92_v40, %v89_v36  ;;  %p1329_p12 = pnand %p1328_p11, %p1322_p8 }
  0x1e   :  { %1192 = vmatpush3.bf16.msra.mxu0 %v1392_v14  ;;  %v178_v42 = vand.u32 4294901760, %v177_v34  ;;  %v185_v43 = vand.u32 4294901760, %v184_v35  ;;  %v1451_v53 = vpack.c.bf16 %v197_v48, %v190_v47  ;;  %v198_v55 = vsub.f32 %v1425_v38, %v197_v48 }
  0x1f   :  { %1096 = vmatpush3.bf16.msra.mxu1 %v1392_v14  ;;  %1194 = vmatprep.subr.bf16.mxu0 %v1400_v19  ;;  %v98_v57 = vand.u32 4294901760, %v1436_v44  ;;  %v204_v59 = vand.u32 4294901760, %v1446_v50  ;;  %v211_v60 = vand.u32 4294901760, %v1448_v51  ;;  %v162_v62 = vand.u32 4294901760, %v1438_v45 }
  0x20   :  { %1098 = vmatprep.subr.bf16.mxu1 %v1400_v19  ;;  %v1444_v49 = vpack.c.bf16 %v185_v43, %v178_v42  ;;  %v169_v63 = vand.u32 4294901760, %v1440_v46  ;;  %v192_v0 = vand.u32 4294901760, %v191_v54  ;;  %v199_v1 = vand.u32 4294901760, %v198_v55 }
  0x21   :  { %v1468_v2 = vpack.c.bf16 %v211_v60, %v204_v59  ;;  %v205_v3 = vsub.f32 %v1446_v50, %v204_v59  ;;  %v212_v4 = vsub.f32 %v1448_v51, %v211_v60  ;;  %v1472_v5 = vsub.f32 %v38_v22, %v83_v26 }
  0x22   :  { %1196 = vmatpush3.bf16.msra.mxu0 %v1400_v19  ;;  %v101_v6 = vand.u32 4294901760, %v1460_v58  ;;  %v1475_v7 = vpack.c.bf16 %v199_v1, %v192_v0  ;;  %v1477_v8 = vsub.f32 %v39_v23, %v86_v27  ;;  %v104_v9 = vand.u32 4294901760, %v45_v61 }
  0x23   :  { %1100 = vmatpush3.bf16.msra.mxu1 %v1400_v19  ;;  %1198 = vmatprep.subr.bf16.mxu0 %v1414_v31  ;;  %v206_v10 = vand.u32 4294901760, %v205_v3  ;;  %v213_v11 = vand.u32 4294901760, %v212_v4  ;;  %v218_v12 = vand.u32 4294901760, %v1472_v5  ;;  %v1484_v15 = vpack.c.bf16 %v98_v57, %v95_v52 }
  0x24   :  { %1102 = vmatprep.subr.bf16.mxu1 %v1414_v31  ;;  %v163_v16 = vsub.f32 %v1438_v45, %v162_v62  ;;  %v170_v17 = vsub.f32 %v1440_v46, %v169_v63  ;;  %v225_v18 = vand.u32 4294901760, %v1477_v8  ;;  %v231_v22 = vsub.f32 %v1408_v28, %v89_v36 }
  0x25   :  { %v1489_v20 = vpack.c.bf16 %v213_v11, %v206_v10  ;;  %v219_v21 = vsub.f32 %v1472_v5, %v218_v12  ;;  %v238_v23 = vsub.f32 %v1416_v32, %v92_v40  ;;  %v1501_v35 = vpack.c.bf16 %v104_v9, %v101_v6 }
  0x26   :  { %1200 = vmatpush3.bf16.msra.mxu0 %v1414_v31  ;;  %v1494_v26 = vpack.c.bf16 %v225_v18, %v218_v12  ;;  %v226_v27 = vsub.f32 %v1477_v8, %v225_v18  ;;  %v232_v30 = vand.u32 4294901760, %v231_v22  ;;  %v164_v28 = vand.u32 4294901760, %v163_v16 }
  0x27   :  { %1104 = vmatpush3.bf16.msra.mxu1 %v1414_v31  ;;  %1202 = vmatprep.subr.bf16.mxu0 %v1429_v39  ;;  %v220_v29 = vand.u32 4294901760, %v219_v21  ;;  %v239_v34 = vand.u32 4294901760, %v238_v23  ;;  %v171_v36 = vand.u32 4294901760, %v170_v17  ;;  %v245_v47 = vsub.f32 %v1432_v41, %v95_v52 }
  0x28   :  { %1106 = vmatprep.subr.bf16.mxu1 %v1429_v39  ;;  %v227_v32 = vand.u32 4294901760, %v226_v27  ;;  %v233_v42 = vsub.f32 %v231_v22, %v232_v30  ;;  %v252_v54 = vsub.f32 %v1436_v44, %v98_v57  ;;  %v1217_v0 = vpack.c.bf16 %v169_v63, %v162_v62 }
  0x29   :  { %v1503_v40 = vpack.c.bf16 %v239_v34, %v232_v30  ;;  %v240_v43 = vsub.f32 %v238_v23, %v239_v34  ;;  %v246_v60 = vand.u32 4294901760, %v245_v47  ;;  %v1121_v1 = vpack.c.bf16 %v171_v36, %v164_v28 }
  0x2a   :  { %1204 = vmatpush3.bf16.msra.mxu0 %v1429_v39  ;;  %v1506_v48 = vpack.c.bf16 %v227_v32, %v220_v29  ;;  %v234_v55 = vand.u32 4294901760, %v233_v42  ;;  %v253_v3 = vand.u32 4294901760, %v252_v54  ;;  %v259_v52 = vsub.f32 %v1460_v58, %v101_v6 }
  0x2b   :  { %1108 = vmatpush3.bf16.msra.mxu1 %v1429_v39  ;;  %1206 = vmatprep.subr.bf16.mxu0 %v1457_v56  ;;  %v241_v59 = vand.u32 4294901760, %v240_v43  ;;  %v247_v41 = vsub.f32 %v245_v47, %v246_v60  ;;  %v266_v44 = vsub.f32 %v45_v61, %v104_v9  ;;  %v1526_v9 = vpack.c.bf16 %v1440_v46, %v1438_v45 }
  0x2c   :  { %1110 = vmatprep.subr.bf16.mxu1 %v1457_v56  ;;  %v1516_v57 = vpack.c.bf16 %v253_v3, %v246_v60  ;;  %v254_v10 = vsub.f32 %v252_v54, %v253_v3  ;;  %v260_v12 = vand.u32 4294901760, %v259_v52  ;;  %v1530_v27 = vpack.c.bf16 %v1404_v25, %v1402_v24 }
  0x2d   :  { %v1513_v4 = vpack.c.bf16 %v241_v59, %v234_v55  ;;  %v248_v11 = vand.u32 4294901760, %v247_v41  ;;  %v267_v16 = vand.u32 4294901760, %v266_v44  ;;  %v1534_v29 = vpack.c.bf16 %v1425_v38, %v1423_v37 }
  0x2e   :  { %1208 = vmatpush3.bf16.msra.mxu0 %v1457_v56  ;;  %v255_v62 = vand.u32 4294901760, %v254_v10  ;;  %v261_v17 = vsub.f32 %v259_v52, %v260_v12  ;;  %v1538_v30 = vpack.c.bf16 %v1448_v51, %v1446_v50  ;;  %v1542_v34 = vpack.c.bf16 %v1477_v8, %v1472_v5 }
  0x2f   :  { %1112 = vmatpush3.bf16.msra.mxu1 %v1457_v56  ;;  %1210 = vmatprep.subr.bf16.mxu0 %v1484_v15  ;;  %v1520_v63 = vpack.c.bf16 %v267_v16, %v260_v12  ;;  %v268_v18 = vsub.f32 %v266_v44, %v267_v16  ;;  %v1544_v28 = vpack.c.bf16 %v238_v23, %v231_v22  ;;  %v28_v24 = vlaneseq }
  0x30   :  { %1114 = vmatprep.subr.bf16.mxu1 %v1484_v15  ;;  %v1145_v21 = vpack.c.bf16 %v255_v62, %v248_v11  ;;  %v262_v58 = vand.u32 4294901760, %v261_v17  ;;  %v1546_v45 = vpack.c.bf16 %v252_v54, %v245_v47  ;;  %v1548_v46 = vpack.c.bf16 %v266_v44, %v259_v52 }
  0x31   :  { %v269_v61 = vand.u32 4294901760, %v268_v18  ;;  %v1550_v25 = vand.u32 127, %v28_v24  ;;  %v1351_v37 = vmov 0.0   ;;  %v1352_v47 = vmov 1.0  }
  0x32   :  { %1212 = vmatpush3.bf16.msra.mxu0 %v1484_v15 }
  0x33   :  { %1116 = vmatpush3.bf16.msra.mxu1 %v1484_v15  ;;  %1214 = vmatprep.subr.bf16.mxu0 %v1501_v35  ;;  %v1522_v6 = vpack.c.bf16 %v269_v61, %v262_v58 }
  0x34   :  { %1118 = vmatprep.subr.bf16.mxu1 %v1501_v35 }
  0x36   :  { %1216 = vmatpush3.bf16.msra.mxu0 %v1501_v35 }
  0x37   :  { %1120 = vmatpush3.bf16.msra.mxu1 %v1501_v35  ;;  %1218 = vmatprep.subr.bf16.mxu0 %v1217_v0 }
  0x38   :  { %1122 = vmatprep.subr.bf16.mxu1 %v1121_v1 }
  0x94   :  { %v48_v36 = vpop.permute.xlu0 %47 }
  0x95   :  { %vm52_vm0 = vcmp.eq.s32.totalorder %v48_v36, %v1550_v25 }
  0x96   :  { %v763_v38 = vsel %vm52_vm0, 1.0, %v1351_v37 }
  0x97   :  { %v140_v50 = vsub.f32 %v763_v38, %v763_v38 }
  0x98   :  { %v1555_v51 = vpop.permute.xlu0 %50 }
  0x99   :  { %vm53_vm1 = vcmp.eq.s32.totalorder %v1555_v51, %v1550_v25  ;;  %v141_v5 = vand.u32 4294901760, %v140_v50 }
  0x9a   :  { %v764_v8 = vsel %vm53_vm1, 1.0, %v1351_v37 }
  0x9b   :  { %v1562_v22 = vsub.f32 %v764_v8, %v764_v8  ;;  %1016 = vmatprep.mubr.f32.mxu0 %v141_v5  ;;  %v142_v23 = vsub.f32 %v140_v50, %v141_v5 }
  0x9d   :  { %v143_v32 = vand.u32 4294901760, %v142_v23  ;;  %v151_v42 = vand.u32 4294901760, %v1562_v22 }
  0x9f   :  { %911 = vmatprep.mubr.f32.mxu1 %v143_v32  ;;  %1017 = vmatmul.mubr.f32.vlgmr.msra.gmra.mrb[0].mxu0 %v151_v42  ;;  %v152_v43 = vsub.f32 %v1562_v22, %v151_v42 }
  0xa0   :  { %1220 = vmatpush3.bf16.msra.mxu0 %v1217_v0  ;;  %1051 = vmatprep.mubr.msk.f32.mxu0 %vm52_vm0, %v1352_v47 }
  0xa1   :  { %1222 = vmatprep.subr.bf16.mxu0 %v1418_v33  ;;  %v153_v54 = vand.u32 4294901760, %v152_v43 }
  0xa3   :  { %912 = vmatmul.mubr.f32.vlgmr.msra.gmra.mrb[0].mxu1 %v153_v54 }
  0xa4   :  { %1124 = vmatpush3.bf16.msra.mxu1 %v1121_v1  ;;  %1224 = vmatpush3.bf16.msra.mxu0 %v1418_v33 }
  0xa5   :  { %946 = vmatprep.mubr.msk.f32.mxu1 %vm52_vm0, %v1352_v47  ;;  %1126 = vmatprep.subr.bf16.mxu1 %v1444_v49 }
  0xa6   :  { %1226 = vmatprep.subr.bf16.mxu0 %v1451_v53 }
  0xa8   :  { %1128 = vmatpush3.bf16.msra.mxu1 %v1444_v49  ;;  %1228 = vmatpush3.bf16.msra.mxu0 %v1451_v53 }
  0xa9   :  { %1130 = vmatprep.subr.bf16.mxu1 %v1475_v7  ;;  %1230 = vmatprep.subr.bf16.mxu0 %v1468_v2 }
  0xac   :  { %1132 = vmatpush3.bf16.msra.mxu1 %v1475_v7  ;;  %1232 = vmatpush3.bf16.msra.mxu0 %v1468_v2 }
  0xad   :  { %1134 = vmatprep.subr.bf16.mxu1 %v1489_v20  ;;  %1234 = vmatprep.subr.bf16.mxu0 %v1494_v26 }
  0xb0   :  { %1136 = vmatpush3.bf16.msra.mxu1 %v1489_v20  ;;  %1236 = vmatpush3.bf16.msra.mxu0 %v1494_v26 }
  0xb1   :  { %1138 = vmatprep.subr.bf16.mxu1 %v1506_v48  ;;  %1238 = vmatprep.subr.bf16.mxu0 %v1503_v40 }
  0xb4   :  { %1140 = vmatpush3.bf16.msra.mxu1 %v1506_v48  ;;  %1240 = vmatpush3.bf16.msra.mxu0 %v1503_v40 }
  0xb5   :  { %1142 = vmatprep.subr.bf16.mxu1 %v1513_v4  ;;  %1242 = vmatprep.subr.bf16.mxu0 %v1516_v57 }
  0xb8   :  { %1144 = vmatpush3.bf16.msra.mxu1 %v1513_v4  ;;  %1244 = vmatpush3.bf16.msra.mxu0 %v1516_v57 }
  0xb9   :  { %1146 = vmatprep.subr.bf16.mxu1 %v1145_v21  ;;  %1246 = vmatprep.subr.bf16.mxu0 %v1520_v63 }
  0xbc   :  { %1148 = vmatpush3.bf16.msra.mxu1 %v1145_v21  ;;  %1248 = vmatpush3.bf16.msra.mxu0 %v1520_v63 }
  0xbd   :  { %1150 = vmatprep.subr.bf16.mxu1 %v1522_v6  ;;  %1250 = vmatprep.subr.bf16.mxu0 %v1390_v13 }
  0xbf   :  { %1052 = vmatmul.mubr.msk.f32.vlgmr.msra.gmra.mrb[0].mxu0 %vm53_vm1, %v1352_v47 }
  0xc0   :  { %1152 = vmatpush3.bf16.msra.mxu1 %v1522_v6  ;;  %1252 = vmatpush3.bf16.msra.mxu0 %v1390_v13 }
  0xc1   :  { %1086 = vmatprep.mubr.msk.f32.mxu0 %vm52_vm0, %v1352_v47  ;;  %1154 = vmatprep.subr.bf16.mxu1 %v1526_v9 }
  0xc2   :  { %1254 = vmatprep.subr.bf16.mxu0 %v1392_v14 }
  0xc3   :  { %947 = vmatmul.mubr.msk.f32.vlgmr.msra.gmra.mrb[0].mxu1 %vm53_vm1, %v1352_v47 }
  0xc4   :  { %1156 = vmatpush3.bf16.msra.mxu1 %v1526_v9  ;;  %981 = vmatprep.mubr.f32.mxu1 %v140_v50 }
  0xc5   :  { %1256 = vmatpush3.bf16.msra.mxu0 %v1392_v14  ;;  %1158 = vmatprep.subr.bf16.mxu1 %v1530_v27 }
  0xc6   :  { %1258 = vmatprep.subr.bf16.mxu0 %v1400_v19 }
  0xc8   :  { %1160 = vmatpush3.bf16.msra.mxu1 %v1530_v27 }
  0xc9   :  { %1260 = vmatpush3.bf16.msra.mxu0 %v1400_v19  ;;  %1162 = vmatprep.subr.bf16.mxu1 %v1534_v29 }
  0xca   :  { %1262 = vmatprep.subr.bf16.mxu0 %v1414_v31 }
  0xcc   :  { %1164 = vmatpush3.bf16.msra.mxu1 %v1534_v29 }
  0xcd   :  { %1264 = vmatpush3.bf16.msra.mxu0 %v1414_v31  ;;  %1166 = vmatprep.subr.bf16.mxu1 %v1538_v30 }
  0xce   :  { %1266 = vmatprep.subr.bf16.mxu0 %v1429_v39 }
  0xd0   :  { %1168 = vmatpush3.bf16.msra.mxu1 %v1538_v30 }
  0xd1   :  { %1268 = vmatpush3.bf16.msra.mxu0 %v1429_v39  ;;  %1170 = vmatprep.subr.bf16.mxu1 %v1542_v34 }
  0xd2   :  { %1270 = vmatprep.subr.bf16.mxu0 %v1457_v56 }
  0xd4   :  { %1172 = vmatpush3.bf16.msra.mxu1 %v1542_v34 }
  0xd5   :  { %1272 = vmatpush3.bf16.msra.mxu0 %v1457_v56  ;;  %1174 = vmatprep.subr.bf16.mxu1 %v1544_v28 }
  0xd6   :  { %1274 = vmatprep.subr.bf16.mxu0 %v1484_v15 }
  0xd8   :  { %1176 = vmatpush3.bf16.msra.mxu1 %v1544_v28 }
  0xd9   :  { %1276 = vmatpush3.bf16.msra.mxu0 %v1484_v15  ;;  %1178 = vmatprep.subr.bf16.mxu1 %v1546_v45 }
  0xda   :  { %1278 = vmatprep.subr.bf16.mxu0 %v1501_v35 }
  0xdc   :  { %1180 = vmatpush3.bf16.msra.mxu1 %v1546_v45 }
  0xdd   :  { %1280 = vmatpush3.bf16.msra.mxu0 %v1501_v35  ;;  %1182 = vmatprep.subr.bf16.mxu1 %v1548_v46 }
  0xe0   :  { %1087 = vmatmul.mubr.msk.f32.vlgmr.msra.gmra.mrb[0].mxu0 %vm53_vm1, %v1352_v47  ;;  %1184 = vmatpush3.bf16.msra.mxu1 %v1548_v46 }
  0xe3   :  { %982 = vmatmul.mubr.f32.vlgmr.msra.gmra.mrb[0].mxu1 %v1562_v22 }
 0x1b3   :  { %v1088_v13 = vpop.f32.mrb[0].mxu0 }
 0x1b4   :  { %v732_v14 = vpop.f32.mrb[1].mxu0 }
 0x1b6   :  { %v983_v19 = vpop.f32.mrb[0].mxu1 }
 0x1b7   :  { %v1281_v31 = vadd.f32 %v1088_v13, %v983_v19  ;;  %v416_v33 = vpop.f32.mrb[1].mxu1 }
 0x1b8   :  { %v1282_v39 = vadd.f32 %v732_v14, %v416_v33 }
 0x1b9   :  { %v743_v49 = vmul.f32 11.313708, %v1281_v31 }
 0x1ba   :  { %v742_v53 = vmul.f32 11.313708, %v1282_v39 }
 0x1bb   :  { %745 = vst [vmem:[#allocation5 + $0x8] sm:$0xff] %v743_v49 }
 0x1bc   :  { %744 = vst [vmem:[#allocation5] sm:$0xff] %v742_v53 }
 0x1bd   :  { %1332 = shalt.err (!%p1329_p12)
}
 0x1be   :  { %s1333_s30 = scalar_lea.hbm %s1663_s2, 256 }
 0x1bf   :  { %p1334_p13 = scmp.ne.s32.totalorder %s1663_s2, %s1333_s30  ;;  %p1337_p0 = scmp.lt.u32.totalorder %s1333_s30, %s1663_s2 }
 0x1c1   :  { %p1339_p1 = pnand %p1337_p0, %p1334_p13 }
 0x1c3   :  { %1342 = shalt.err (!%p1339_p1)
}
 0x1c4   :  { %757 = dma.vmem_to_hbm [thread:$0]  %s752_s1, 256, %s1663_s2, [#allocation4], %s1348_s19, %s1348_s19, %s1349_s20  }
 0x1c5   :  { %1345 = dma.done.wait [#allocation4], 256  }
 0x1c6   :  { %1346 = vsyncadd [#allocation4], 4294967040 }
 0x1c7   :  { %761 = vsyncpa [#allocation3], 1 }
 0x1c8   :  { %762 = vsyncpa [#allocation4], 1 }

</bundles_post_ra>
